<compile_context>
chip_gen: v5e
topology: v5e:2x2
jax: 0.10.0
libtpu: 0.0.40
codegen_flags: <defaults>
</compile_context>

<pallas_src>
import jax
import jax.numpy as jnp
from jax.experimental import pallas as pl
from jax.experimental.pallas import tpu as pltpu


# ---------------------------------------------------------------------------
# Fused kernel: conv3x3 + maxpool3x3/3 (as 9 tap matmuls + max) + bias + tanh^2
# ---------------------------------------------------------------------------
def _fused_conv_pool_tanh_kernel(p_ref, w_ref, b_ref, o_ref):
    # p_ref: (Cin*25, N*Ho*Wo)      5x5/stride-3 im2col patches (one per pool win)
    # w_ref: (9, Cout, Cin*25)      per-pool-tap zero-padded conv weights
    # b_ref: (Cout, 1)
    # o_ref: (Cout, N*Ho*Wo)        lane-dense (128 lanes) output tile
    p = p_ref[...]                                     # (K, 128) in VMEM

    # 9 tap matmuls; max-pool is just jnp.maximum over the raw accumulators.
    m = None
    for k in range(9):
        yk = jax.lax.dot_general(
            w_ref[k], p,
            (((1,), (0,)), ((), ())),
            preferred_element_type=jnp.float32)        # (Cout, 128)
        m = yk if m is None else jnp.maximum(m, yk)

    # Bias + both tanh applied AFTER the pool (tanh is monotone increasing):
    #   tanh(maxpool(tanh(conv + b))) == tanh(tanh(maxpool(conv) + b))
    o_ref[...] = jnp.tanh(jnp.tanh(m + b_ref[...]))


# ---------------------------------------------------------------------------
# Wrapper: layout glue (5x5 im2col + weight expansion) + pallas_call
# ---------------------------------------------------------------------------
def _build_patches_5x5(x_nchw, Ho, Wo):
    """Return (Cin*25, N*Ho*Wo) where
       patch[(cin,u,v), (n,oh,ow)] = x_pad[n, cin, 3*oh + u, 3*ow + v]
    i.e. the 5x5 padded-input patch feeding pool window (oh, ow)."""
    N, Cin, H, W = x_nchw.shape
    xp = jnp.pad(x_nchw, ((0, 0), (0, 0), (1, 1), (1, 1)))        # (N,Cin,H+2,W+2)
    taps = [xp[:, :, u:u + 3 * Ho:3, v:v + 3 * Wo:3]               # (N,Cin,Ho,Wo)
            for u in range(5) for v in range(5)]
    pat = jnp.stack(taps, axis=2)                                  # (N,Cin,25,Ho,Wo)
    pat = pat.transpose(1, 2, 0, 3, 4)                             # (Cin,25,N,Ho,Wo)
    return pat.reshape(Cin * 25, N * Ho * Wo)


def _expand_weight(w_oihw):
    """Return (9, Cout, Cin*25):
       W[k=(r,c), cout, (cin,u,v)] = w[cout, cin, u-r, v-c] if 0<=u-r<3, 0<=v-c<3
                                     else 0
    so that tap-k matmul against the 5x5 patches equals the conv output at
    pool-window position (r, c)."""
    Cout, Cin = w_oihw.shape[0], w_oihw.shape[1]
    mats = []
    for r in range(3):
        for c in range(3):
            wk = jnp.pad(w_oihw, ((0, 0), (0, 0), (r, 2 - r), (c, 2 - c)))
            mats.append(wk.reshape(Cout, Cin * 25))
    return jnp.stack(mats, axis=0)


@jax.jit
def model_tanh_forward(x_nchw, w_oihw, bias):
    N, Cin, H, W = x_nchw.shape
    Cout = w_oihw.shape[0]
    Ho = (H - 3) // 3 + 1
    Wo = (W - 3) // 3 + 1
    K = Cin * 25                     # 5x5 patch rows
    L = N * Ho * Wo                  # lane width of every slab / the output

    patches = _build_patches_5x5(x_nchw, Ho, Wo).astype(jnp.float32)   # (K, L)
    w_exp = _expand_weight(w_oihw.astype(jnp.float32))                 # (9,Cout,K)
    b2 = bias.reshape(Cout, 1).astype(jnp.float32)                     # (Cout,1)

    flops = 2 * 9 * Cout * K * L
    transcendentals = 2 * Cout * L
    bytes_accessed = 4 * (patches.size + w_exp.size + b2.size + Cout * L)

    out = pl.pallas_call(
        _fused_conv_pool_tanh_kernel,
        out_shape=jax.ShapeDtypeStruct((Cout, L), jnp.float32),
        grid=(1,),
        in_specs=[
            pl.BlockSpec((K, L), lambda i: (0, 0)),
            pl.BlockSpec((9, Cout, K), lambda i: (0, 0, 0)),
            pl.BlockSpec((Cout, 1), lambda i: (0, 0)),
        ],
        out_specs=pl.BlockSpec((Cout, L), lambda i: (0, 0)),
        compiler_params=pltpu.CompilerParams(
            dimension_semantics=("arbitrary",)),
        cost_estimate=pl.CostEstimate(
            flops=flops,
            transcendentals=transcendentals,
            bytes_accessed=bytes_accessed),
    )(patches, w_exp, b2)

    # Channel-major (Cout, N, Ho, Wo) -> NCHW; ~2 KB transpose, negligible.
    return out.reshape(Cout, N, Ho, Wo).transpose(1, 0, 2, 3)


if __name__ == "__main__":
    key = jax.random.PRNGKey(0)
    kx, kw, kb = jax.random.split(key, 3)

    # Small shapes consistent with the module: Cin = 18, Cout = 4.
    N, Cin, H, W = 2, 18, 24, 24
    Cout = 4

    x = jax.random.normal(kx, (N, Cin, H, W), dtype=jnp.float32)
    w = jax.random.normal(kw, (Cout, Cin, 3, 3), dtype=jnp.float32) * 0.1
    b = jax.random.normal(kb, (Cout,), dtype=jnp.float32) * 0.1

    out = model_tanh_forward(x, w, b)
    out = jax.block_until_ready(out)

    # Pure-JAX reference check.
    conv_ref = jax.lax.conv_general_dilated(
        x, w, (1, 1), ((1, 1), (1, 1)),
        dimension_numbers=("NCHW", "OIHW", "NCHW"),
        precision=jax.lax.Precision.HIGHEST)
    v1_ref = jnp.tanh(conv_ref + b.reshape(1, -1, 1, 1))
    pooled_ref = jax.lax.reduce_window(
        v1_ref, -jnp.inf, jax.lax.max, (1, 1, 3, 3), (1, 1, 3, 3), "VALID")
    ref = jnp.tanh(pooled_ref)

    assert out.shape == (N, Cout, H // 3, W // 3), out.shape
    assert jnp.allclose(out, ref, atol=1e-3, rtol=1e-3), \
        float(jnp.max(jnp.abs(out - ref)))

    print("KERNEL_OK")
</pallas_src>

<mosaic_0001>
module attributes {stable_mosaic.version = 11 : i64} {
  func.func @_fused_conv_pool_tanh_kernel(%arg0: i32, %arg1: memref<450x128xf32, #tpu.memory_space<vmem>>, %arg2: memref<9x4x450xf32, #tpu.memory_space<vmem>>, %arg3: memref<4x1xf32, #tpu.memory_space<vmem>>, %arg4: memref<4x128xf32, #tpu.memory_space<vmem>>) attributes {dimension_semantics = [#tpu.dimension_semantics<arbitrary>], iteration_bounds = array<i64: 1>, scalar_prefetch = 0 : i64, scratch_operands = 0 : i64, tpu.core_type = #tpu.core_type<tc>, window_params = [{pipeline_mode = #tpu.pipeline_mode<synchronous>, transform_indices = @transform_0, window_bounds = array<i64: 450, 128>}, {pipeline_mode = #tpu.pipeline_mode<synchronous>, transform_indices = @transform_1, window_bounds = array<i64: 9, 4, 450>}, {pipeline_mode = #tpu.pipeline_mode<synchronous>, transform_indices = @transform_2, window_bounds = array<i64: 4, 1>}, {pipeline_mode = #tpu.pipeline_mode<synchronous>, transform_indices = @transform_3, window_bounds = array<i64: 4, 128>}]} {
    %c0 = arith.constant 0 : index
    %c0_0 = arith.constant 0 : index
    %0 = vector.load %arg1[%c0, %c0_0] : memref<450x128xf32, #tpu.memory_space<vmem>>, vector<450x128xf32>
    %c0_1 = arith.constant 0 : index
    %c0_2 = arith.constant 0 : index
    %c0_3 = arith.constant 0 : index
    %1 = vector.load %arg2[%c0_1, %c0_2, %c0_3] : memref<9x4x450xf32, #tpu.memory_space<vmem>>, vector<1x4x450xf32>
    %2 = vector.shape_cast %1 : vector<1x4x450xf32> to vector<4x450xf32>
    %cst = arith.constant dense<0.000000e+00> : vector<4x128xf32>
    %3 = tpu.matmul %2, %0, %cst {dimension_numbers = #tpu.dot_dimension_numbers<[1], [0], [0], [1], [0, 0, 1, 1], [], []>} : vector<4x450xf32>, vector<450x128xf32>, vector<4x128xf32> -> vector<4x128xf32>
    %c1 = arith.constant 1 : index
    %c0_4 = arith.constant 0 : index
    %c0_5 = arith.constant 0 : index
    %4 = vector.load %arg2[%c1, %c0_4, %c0_5] : memref<9x4x450xf32, #tpu.memory_space<vmem>>, vector<1x4x450xf32>
    %5 = vector.shape_cast %4 : vector<1x4x450xf32> to vector<4x450xf32>
    %cst_6 = arith.constant dense<0.000000e+00> : vector<4x128xf32>
    %6 = tpu.matmul %5, %0, %cst_6 {dimension_numbers = #tpu.dot_dimension_numbers<[1], [0], [0], [1], [0, 0, 1, 1], [], []>} : vector<4x450xf32>, vector<450x128xf32>, vector<4x128xf32> -> vector<4x128xf32>
    %7 = arith.maximumf %3, %6 : vector<4x128xf32>
    %c2 = arith.constant 2 : index
    %c0_7 = arith.constant 0 : index
    %c0_8 = arith.constant 0 : index
    %8 = vector.load %arg2[%c2, %c0_7, %c0_8] : memref<9x4x450xf32, #tpu.memory_space<vmem>>, vector<1x4x450xf32>
    %9 = vector.shape_cast %8 : vector<1x4x450xf32> to vector<4x450xf32>
    %cst_9 = arith.constant dense<0.000000e+00> : vector<4x128xf32>
    %10 = tpu.matmul %9, %0, %cst_9 {dimension_numbers = #tpu.dot_dimension_numbers<[1], [0], [0], [1], [0, 0, 1, 1], [], []>} : vector<4x450xf32>, vector<450x128xf32>, vector<4x128xf32> -> vector<4x128xf32>
    %11 = arith.maximumf %7, %10 : vector<4x128xf32>
    %c3 = arith.constant 3 : index
    %c0_10 = arith.constant 0 : index
    %c0_11 = arith.constant 0 : index
    %12 = vector.load %arg2[%c3, %c0_10, %c0_11] : memref<9x4x450xf32, #tpu.memory_space<vmem>>, vector<1x4x450xf32>
    %13 = vector.shape_cast %12 : vector<1x4x450xf32> to vector<4x450xf32>
    %cst_12 = arith.constant dense<0.000000e+00> : vector<4x128xf32>
    %14 = tpu.matmul %13, %0, %cst_12 {dimension_numbers = #tpu.dot_dimension_numbers<[1], [0], [0], [1], [0, 0, 1, 1], [], []>} : vector<4x450xf32>, vector<450x128xf32>, vector<4x128xf32> -> vector<4x128xf32>
    %15 = arith.maximumf %11, %14 : vector<4x128xf32>
    %c4 = arith.constant 4 : index
    %c0_13 = arith.constant 0 : index
    %c0_14 = arith.constant 0 : index
    %16 = vector.load %arg2[%c4, %c0_13, %c0_14] : memref<9x4x450xf32, #tpu.memory_space<vmem>>, vector<1x4x450xf32>
    %17 = vector.shape_cast %16 : vector<1x4x450xf32> to vector<4x450xf32>
    %cst_15 = arith.constant dense<0.000000e+00> : vector<4x128xf32>
    %18 = tpu.matmul %17, %0, %cst_15 {dimension_numbers = #tpu.dot_dimension_numbers<[1], [0], [0], [1], [0, 0, 1, 1], [], []>} : vector<4x450xf32>, vector<450x128xf32>, vector<4x128xf32> -> vector<4x128xf32>
    %19 = arith.maximumf %15, %18 : vector<4x128xf32>
    %c5 = arith.constant 5 : index
    %c0_16 = arith.constant 0 : index
    %c0_17 = arith.constant 0 : index
    %20 = vector.load %arg2[%c5, %c0_16, %c0_17] : memref<9x4x450xf32, #tpu.memory_space<vmem>>, vector<1x4x450xf32>
    %21 = vector.shape_cast %20 : vector<1x4x450xf32> to vector<4x450xf32>
    %cst_18 = arith.constant dense<0.000000e+00> : vector<4x128xf32>
    %22 = tpu.matmul %21, %0, %cst_18 {dimension_numbers = #tpu.dot_dimension_numbers<[1], [0], [0], [1], [0, 0, 1, 1], [], []>} : vector<4x450xf32>, vector<450x128xf32>, vector<4x128xf32> -> vector<4x128xf32>
    %23 = arith.maximumf %19, %22 : vector<4x128xf32>
    %c6 = arith.constant 6 : index
    %c0_19 = arith.constant 0 : index
    %c0_20 = arith.constant 0 : index
    %24 = vector.load %arg2[%c6, %c0_19, %c0_20] : memref<9x4x450xf32, #tpu.memory_space<vmem>>, vector<1x4x450xf32>
    %25 = vector.shape_cast %24 : vector<1x4x450xf32> to vector<4x450xf32>
    %cst_21 = arith.constant dense<0.000000e+00> : vector<4x128xf32>
    %26 = tpu.matmul %25, %0, %cst_21 {dimension_numbers = #tpu.dot_dimension_numbers<[1], [0], [0], [1], [0, 0, 1, 1], [], []>} : vector<4x450xf32>, vector<450x128xf32>, vector<4x128xf32> -> vector<4x128xf32>
    %27 = arith.maximumf %23, %26 : vector<4x128xf32>
    %c7 = arith.constant 7 : index
    %c0_22 = arith.constant 0 : index
    %c0_23 = arith.constant 0 : index
    %28 = vector.load %arg2[%c7, %c0_22, %c0_23] : memref<9x4x450xf32, #tpu.memory_space<vmem>>, vector<1x4x450xf32>
    %29 = vector.shape_cast %28 : vector<1x4x450xf32> to vector<4x450xf32>
    %cst_24 = arith.constant dense<0.000000e+00> : vector<4x128xf32>
    %30 = tpu.matmul %29, %0, %cst_24 {dimension_numbers = #tpu.dot_dimension_numbers<[1], [0], [0], [1], [0, 0, 1, 1], [], []>} : vector<4x450xf32>, vector<450x128xf32>, vector<4x128xf32> -> vector<4x128xf32>
    %31 = arith.maximumf %27, %30 : vector<4x128xf32>
    %c8 = arith.constant 8 : index
    %c0_25 = arith.constant 0 : index
    %c0_26 = arith.constant 0 : index
    %32 = vector.load %arg2[%c8, %c0_25, %c0_26] : memref<9x4x450xf32, #tpu.memory_space<vmem>>, vector<1x4x450xf32>
    %33 = vector.shape_cast %32 : vector<1x4x450xf32> to vector<4x450xf32>
    %cst_27 = arith.constant dense<0.000000e+00> : vector<4x128xf32>
    %34 = tpu.matmul %33, %0, %cst_27 {dimension_numbers = #tpu.dot_dimension_numbers<[1], [0], [0], [1], [0, 0, 1, 1], [], []>} : vector<4x450xf32>, vector<450x128xf32>, vector<4x128xf32> -> vector<4x128xf32>
    %35 = arith.maximumf %31, %34 : vector<4x128xf32>
    %c0_28 = arith.constant 0 : index
    %c0_29 = arith.constant 0 : index
    %36 = vector.load %arg3[%c0_28, %c0_29] : memref<4x1xf32, #tpu.memory_space<vmem>>, vector<4x1xf32>
    %37 = vector.broadcast %36 : vector<4x1xf32> to vector<4x128xf32>
    %38 = arith.addf %35, %37 : vector<4x128xf32>
    %39 = math.tanh %38 : vector<4x128xf32>
    %40 = math.tanh %39 : vector<4x128xf32>
    %c0_30 = arith.constant 0 : index
    %c0_31 = arith.constant 0 : index
    %41 = vector.load %arg4[%c0_30, %c0_31] : memref<4x128xf32, #tpu.memory_space<vmem>>, vector<4x128xf32>
    tpu.vector_store %arg4[%c0_30, %c0_31], %40 {strides = array<i32>} : memref<4x128xf32, #tpu.memory_space<vmem>>, vector<4x128xf32>,
    return
  }
  func.func @transform_0(%arg0: i32) -> (i32, i32) {
    %c0_i32 = arith.constant 0 : i32
    %c0_i32_0 = arith.constant 0 : i32
    %c0_i32_1 = arith.constant 0 : i32
    return %c0_i32, %c0_i32_0 : i32, i32
  }
  func.func @transform_1(%arg0: i32) -> (i32, i32, i32) {
    %c0_i32 = arith.constant 0 : i32
    %c0_i32_0 = arith.constant 0 : i32
    %c0_i32_1 = arith.constant 0 : i32
    %c0_i32_2 = arith.constant 0 : i32
    return %c0_i32, %c0_i32_0, %c0_i32_1 : i32, i32, i32
  }
  func.func @transform_2(%arg0: i32) -> (i32, i32) {
    %c0_i32 = arith.constant 0 : i32
    %c0_i32_0 = arith.constant 0 : i32
    %c0_i32_1 = arith.constant 0 : i32
    return %c0_i32, %c0_i32_0 : i32, i32
  }
  func.func @transform_3(%arg0: i32) -> (i32, i32) {
    %c0_i32 = arith.constant 0 : i32
    %c0_i32_0 = arith.constant 0 : i32
    %c0_i32_1 = arith.constant 0 : i32
    return %c0_i32, %c0_i32_0 : i32, i32
  }
}

</mosaic_0001>

<bundles_post_ra>
// kernel: model_tanh_forward.1
= control target key start
LH: loop header
LB: loop body
LE: loop exit
PB: predicated region body
PF: predicated region fallthrough
CT: control target
= control target key end

     0   :  { %vm88_vm0 = vcmask 1041408   ;;  %vm85_vm1 = vcmask 539648   ;;  %s2185_s0 = inlined_call_operand.vmem [shape: f32[450,128], index: 0, kind: input, shape index: {}]   ;;  %s2186_s1 = inlined_call_operand.vmem [shape: f32[9,4,450], index: 1, kind: input, shape index: {}]   ;;  %s2187_s2 = inlined_call_operand.vmem [shape: f32[4,1], index: 2, kind: input, shape index: {}]   ;;  %s2188_s3 = inlined_call_operand.vmem [shape: f32[4,128], index: 3, kind: output, shape index: {}]  }
   0x1   :  { %v1091_v0 = vld [vmem:[%s2185_s0 + $0x78] sm:$0xff]  ;;  %v1101_v2 = vld [vmem:[%s2185_s0 + $0x70] sm:$0xff]  ;;  %v1118_v5 = vld [vmem:[%s2185_s0 + $0x1c0] sm:$0x3] }
   0x2   :  { %v1096_v1 = vld [vmem:[%s2185_s0 + $0x178] sm:$0xff]  ;;  %92 = vmatpush.msra.mxu0 %v1091_v0  ;;  %v1113_v4 = vld [vmem:[%s2185_s0 + $0x170] sm:$0xff]  ;;  %2197 = vst [vmem:[#allocation2_spill] sm:$0xff] %v1118_v5  ;;  %970 = vmatpush.msk.msra.mxu3 %vm88_vm0, %v1118_v5  ;;  %v1126_v6 = vld [vmem:[%s2185_s0 + $0x68] sm:$0xff] }
   0x3   :  { %132 = vmatpush.msra.mxu2 %v1096_v1  ;;  %v1108_v3 = vld [vmem:[%s2185_s0 + $0xf8] sm:$0xff]  ;;  %v1131_v7 = vld [vmem:[%s2185_s0 + $0xf0] sm:$0xff]  ;;  %v1136_v8 = vld [vmem:[%s2185_s0 + $0x168] sm:$0xff] }
   0x4   :  { %112 = vmatpush.msra.mxu1 %v1108_v3  ;;  %93 = vmatpush.msra.mxu0 %v1101_v2  ;;  %v1143_v9 = vld [vmem:[%s2185_s0 + $0x1b8] sm:$0xff]  ;;  %v1148_v10 = vld [vmem:[%s2185_s0 + $0xe8] sm:$0xff]  ;;  %v1155_v11 = vld [vmem:[%s2185_s0 + $0x60] sm:$0xff] }
   0x5   :  { %133 = vmatpush.msra.mxu2 %v1113_v4  ;;  %2198 = vst [vmem:[#allocation3_spill] sm:$0xff] %v1143_v9  ;;  %160 = vmatpush.msra.mxu3 %v1143_v9  ;;  %v1160_v12 = vld [vmem:[%s2185_s0 + $0x160] sm:$0xff]  ;;  %v1165_v13 = vld [vmem:[%s2185_s0 + $0x1b0] sm:$0xff]  ;;  %v1177_v15 = vld [vmem:[%s2185_s0 + $0x1a8] sm:$0xff] }
   0x6   :  { %113 = vmatpush.msra.mxu1 %v1131_v7  ;;  %94 = vmatpush.msra.mxu0 %v1126_v6  ;;  %v1172_v14 = vld [vmem:[%s2185_s0 + $0xe0] sm:$0xff]  ;;  %v1184_v16 = vld [vmem:[%s2185_s0 + $0x58] sm:$0xff]  ;;  %v1208_v20 = vld [vmem:[%s2185_s0 + $0x50] sm:$0xff] }
   0x7   :  { %134 = vmatpush.msra.mxu2 %v1136_v8  ;;  %161 = vmatpush.msra.mxu3 %v1165_v13  ;;  %v1189_v17 = vld [vmem:[%s2185_s0 + $0x158] sm:$0xff]  ;;  %v1201_v19 = vld [vmem:[%s2185_s0 + $0x1a0] sm:$0xff]  ;;  %v1213_v21 = vld [vmem:[%s2185_s0 + $0x150] sm:$0xff] }
   0x8   :  { %114 = vmatpush.msra.mxu1 %v1148_v10  ;;  %95 = vmatpush.msra.mxu0 %v1155_v11  ;;  %v1196_v18 = vld [vmem:[%s2185_s0 + $0xd8] sm:$0xff]  ;;  %v1220_v22 = vld [vmem:[%s2185_s0 + $0xd0] sm:$0xff]  ;;  %v1232_v24 = vld [vmem:[%s2185_s0 + $0x48] sm:$0xff] }
   0x9   :  { %135 = vmatpush.msra.mxu2 %v1160_v12  ;;  %2199 = vst [vmem:[#allocation4_spill] sm:$0xff] %v1196_v18  ;;  %162 = vmatpush.msra.mxu3 %v1177_v15  ;;  %v1225_v23 = vld [vmem:[%s2185_s0 + $0x198] sm:$0xff]  ;;  %v1237_v25 = vld [vmem:[%s2185_s0 + $0x148] sm:$0xff]  ;;  %v1249_v27 = vld [vmem:[%s2185_s0 + $0x190] sm:$0xff] }
   0xa   :  { %115 = vmatpush.msra.mxu1 %v1172_v14  ;;  %96 = vmatpush.msra.mxu0 %v1184_v16  ;;  %v1244_v26 = vld [vmem:[%s2185_s0 + $0xc8] sm:$0xff]  ;;  %v1256_v28 = vld [vmem:[%s2185_s0 + $0x40] sm:$0xff]  ;;  %v1280_v32 = vld [vmem:[%s2185_s0 + $0x38] sm:$0xff] }
   0xb   :  { %136 = vmatpush.msra.mxu2 %v1189_v17  ;;  %163 = vmatpush.msra.mxu3 %v1201_v19  ;;  %v1261_v29 = vld [vmem:[%s2185_s0 + $0x140] sm:$0xff]  ;;  %v1273_v31 = vld [vmem:[%s2185_s0 + $0x188] sm:$0xff]  ;;  %2200 = vst [vmem:[#allocation5_spill] sm:$0xff] %v1280_v32  ;;  %v1285_v33 = vld [vmem:[%s2185_s0 + $0x138] sm:$0xff] }
   0xc   :  { %116 = vmatpush.msra.mxu1 %v1196_v18  ;;  %97 = vmatpush.msra.mxu0 %v1208_v20  ;;  %v1268_v30 = vld [vmem:[%s2185_s0 + $0xc0] sm:$0xff]  ;;  %v1292_v34 = vld [vmem:[%s2185_s0 + $0xb8] sm:$0xff]  ;;  %v1304_v36 = vld [vmem:[%s2185_s0 + $0x30] sm:$0xff] }
   0xd   :  { %137 = vmatpush.msra.mxu2 %v1213_v21  ;;  %164 = vmatpush.msra.mxu3 %v1225_v23  ;;  %v1297_v35 = vld [vmem:[%s2185_s0 + $0x180] sm:$0xff]  ;;  %v1309_v37 = vld [vmem:[%s2185_s0 + $0x130] sm:$0xff]  ;;  %v1323_v39 = vld [vmem:[%s2185_s0 + $0x28] sm:$0xff] }
   0xe   :  { %117 = vmatpush.msra.mxu1 %v1220_v22  ;;  %98 = vmatpush.msra.mxu0 %v1232_v24  ;;  %v1316_v38 = vld [vmem:[%s2185_s0 + $0xb0] sm:$0xff]  ;;  %v1328_v40 = vld [vmem:[%s2185_s0 + $0x128] sm:$0xff]  ;;  %v71_v43 = vld [vmem:[%s2186_s1] sm:$0xff] }
   0xf   :  { %138 = vmatpush.msra.mxu2 %v1237_v25  ;;  %165 = vmatpush.msra.mxu3 %v1249_v27  ;;  %v1335_v41 = vld [vmem:[%s2185_s0 + $0xa8] sm:$0xff]  ;;  %v1348_v44 = vld [vmem:[%s2185_s0 + $0x20] sm:$0xff]  ;;  %75 = vst [vmem:[#allocation1] ss:$2 sm:$0xff] %v71_v43  ;;  %v1367_v47 = vld [vmem:[%s2185_s0 + $0x18] sm:$0xff] }
  0x10   :  { %118 = vmatpush.msra.mxu1 %v1244_v26  ;;  %99 = vmatpush.msra.mxu0 %v1256_v28  ;;  %v72_v42 = vld [vmem:[%s2186_s1 + $0x8] sm:$0xff]  ;;  %v1353_v45 = vld [vmem:[%s2185_s0 + $0x120] sm:$0xff]  ;;  %v1372_v48 = vld [vmem:[%s2185_s0 + $0x118] sm:$0xff] }
  0x11   :  { %139 = vmatpush.msra.mxu2 %v1261_v29  ;;  %166 = vmatpush.msra.mxu3 %v1273_v31  ;;  %77 = vst [vmem:[#allocation1 + $0x10] ss:$2 sm:$0xff] %v72_v42  ;;  %v1360_v46 = vld [vmem:[%s2185_s0 + $0xa0] sm:$0xff]  ;;  %v1379_v49 = vld [vmem:[%s2185_s0 + $0x98] sm:$0xff]  ;;  %v1386_v50 = vld [vmem:[%s2185_s0 + $0x10] sm:$0xff] }
  0x12   :  { %119 = vmatpush.msra.mxu1 %v1268_v30  ;;  %100 = vmatpush.msra.mxu0 %v1280_v32  ;;  %v1391_v51 = vld [vmem:[%s2185_s0 + $0x110] sm:$0xff]  ;;  %v1396_v52 = vld [vmem:[%s2185_s0 + $0x8] sm:$0xff]  ;;  %v973_v55 = vld [vmem:[%s2186_s1 + $0x18] sm:$0xff] }
  0x13   :  { %140 = vmatpush.msra.mxu2 %v1285_v33  ;;  %167 = vmatpush.msra.mxu3 %v1297_v35  ;;  %v1403_v53 = vld [vmem:[%s2185_s0 + $0x90] sm:$0xff]  ;;  %v1408_v54 = vld [vmem:[%s2185_s0 + $0x108] sm:$0xff]  ;;  %v1418_v56 = vld [vmem:[%s2185_s0] sm:$0xff] }
  0x14   :  { %120 = vmatpush.msra.mxu1 %v1292_v34  ;;  %101 = vmatpush.msra.mxu0 %v1304_v36  ;;  %v1423_v57 = vld [vmem:[%s2185_s0 + $0x88] sm:$0xff]  ;;  %v972_v58 = vld [vmem:[%s2186_s1 + $0x10] sm:$0xff]  ;;  %v1435_v61 = vld [vmem:[%s2185_s0 + $0x100] sm:$0xff] }
  0x15   :  { %141 = vmatpush.msra.mxu2 %v1309_v37  ;;  %189 = vmatpush.msrb.mxu3 %v1091_v0  ;;  %v1446_v42 = vld [vmem:[%s2185_s0 + $0x80] sm:$0xff] }
  0x16   :  { %121 = vmatpush.msra.mxu1 %v1316_v38  ;;  %102 = vmatpush.msra.mxu0 %v1323_v39  ;;  %v1437_v62 = vld.sshfl [vmem:[#allocation1] sm:$0xff pattern:$0x75316420]  ;;  %v79_v63 = vld.sshfl [vmem:[#allocation1 + $0x8] sm:$0xff pattern:$0x75316420] }
  0x17   :  { %142 = vmatpush.msra.mxu2 %v1328_v40  ;;  %190 = vmatpush.msrb.mxu3 %v1101_v2  ;;  %177 = vst [vmem:[#allocation1] ss:$2 sm:$0xff] %v972_v58  ;;  %v976_v43 = vld [vmem:[%s2186_s1 + $0x20] sm:$0xff] }
  0x18   :  { %122 = vmatpush.msra.mxu1 %v1335_v41  ;;  %103 = vmatpush.msra.mxu0 %v1348_v44  ;;  %v80_v59 = vld.sshfl [vmem:[#allocation1 + $0x10] sm:$0xff pattern:$0x75316420]  ;;  %v81_v60 = vld.sshfl [vmem:[#allocation1 + $0x18] sm:$0xff pattern:$0x75316420] }
  0x19   :  { %143 = vmatpush.msra.mxu2 %v1353_v45  ;;  %191 = vmatpush.msrb.mxu3 %v1126_v6  ;;  %179 = vst [vmem:[#allocation1 + $0x10] ss:$2 sm:$0xff] %v973_v55 }
  0x1a   :  { %123 = vmatpush.msra.mxu1 %v1360_v46  ;;  %104 = vmatpush.msra.mxu0 %v1367_v47 }
  0x1b   :  { %144 = vmatpush.msra.mxu2 %v1372_v48  ;;  %192 = vmatpush.msrb.mxu3 %v1155_v11 }
  0x1c   :  { %124 = vmatpush.msra.mxu1 %v1379_v49  ;;  %105 = vmatpush.msra.mxu0 %v1386_v50 }
  0x1d   :  { %145 = vmatpush.msra.mxu2 %v1391_v51  ;;  %193 = vmatpush.msrb.mxu3 %v1184_v16 }
  0x1e   :  { %125 = vmatpush.msra.mxu1 %v1403_v53  ;;  %106 = vmatpush.msra.mxu0 %v1396_v52  ;;  %v180_v58 = vld.sshfl [vmem:[#allocation1] sm:$0xff pattern:$0x75316420] }
  0x1f   :  { %146 = vmatpush.msra.mxu2 %v1408_v54  ;;  %194 = vmatpush.msrb.mxu3 %v1208_v20 }
  0x20   :  { %126 = vmatpush.msra.mxu1 %v1423_v57  ;;  %107 = vmatpush.msra.mxu0 %v1418_v56  ;;  %v1464_v55 = vld.sshfl [vmem:[#allocation1 + $0x18] sm:$0xff pattern:$0x75316420] }
  0x21   :  { %147 = vmatpush.msra.mxu2 %v1435_v61  ;;  %195 = vmatpush.msrb.mxu3 %v1232_v24 }
  0x22   :  { %209 = vmatpush.msrb.mxu0 %v1108_v3  ;;  %127 = vmatpush.msra.mxu1 %v1446_v42 }
  0x23   :  { %974 = vmatpush.msk.msrb.mxu2 %vm88_vm0, %v1118_v5  ;;  %196 = vmatpush.msrb.mxu3 %v1256_v28  ;;  %v1468_v5 = vld.sshfl [vmem:[#allocation1 + $0x8] sm:$0xff pattern:$0x75316420] }
  0x24   :  { %210 = vmatpush.msrb.mxu0 %v1131_v7  ;;  %229 = vmatpush.msrb.mxu1 %v1096_v1  ;;  %275 = vst [vmem:[#allocation1] ss:$2 sm:$0xff] %v976_v43  ;;  %v2202_v43 = vld [vmem:[#allocation2_spill] sm:$0xff] }
  0x25   :  { %257 = vmatpush.msrb.mxu2 %v1143_v9  ;;  %197 = vmatpush.msrb.mxu3 %v1280_v32  ;;  %v1472_v9 = vld.sshfl [vmem:[#allocation1 + $0x10] sm:$0xff pattern:$0x75316420]  ;;  %v977_v32 = vld [vmem:[%s2186_s1 + $0x28] sm:$0xff] }
  0x26   :  { %211 = vmatpush.msrb.mxu0 %v1148_v10  ;;  %230 = vmatpush.msrb.mxu1 %v1113_v4  ;;  %277 = vst [vmem:[#allocation1 + $0x10] ss:$2 sm:$0xff] %v977_v32 }
  0x27   :  { %258 = vmatpush.msrb.mxu2 %v1165_v13  ;;  %198 = vmatpush.msrb.mxu3 %v1304_v36 }
  0x28   :  { %212 = vmatpush.msrb.mxu0 %v1172_v14  ;;  %231 = vmatpush.msrb.mxu1 %v1136_v8 }
  0x29   :  { %259 = vmatpush.msrb.mxu2 %v1177_v15  ;;  %199 = vmatpush.msrb.mxu3 %v1323_v39 }
  0x2a   :  { %213 = vmatpush.msrb.mxu0 %v1196_v18  ;;  %232 = vmatpush.msrb.mxu1 %v1160_v12 }
  0x2b   :  { %260 = vmatpush.msrb.mxu2 %v1201_v19  ;;  %200 = vmatpush.msrb.mxu3 %v1348_v44  ;;  %v1517_v32 = vld.sshfl [vmem:[#allocation1] sm:$0xff pattern:$0x75316420] }
  0x2c   :  { %214 = vmatpush.msrb.mxu0 %v1220_v22  ;;  %233 = vmatpush.msrb.mxu1 %v1189_v17 }
  0x2d   :  { %261 = vmatpush.msrb.mxu2 %v1225_v23  ;;  %201 = vmatpush.msrb.mxu3 %v1367_v47 }
  0x2e   :  { %215 = vmatpush.msrb.mxu0 %v1244_v26  ;;  %234 = vmatpush.msrb.mxu1 %v1213_v21 }
  0x2f   :  { %262 = vmatpush.msrb.mxu2 %v1249_v27  ;;  %202 = vmatpush.msrb.mxu3 %v1386_v50 }
  0x30   :  { %216 = vmatpush.msrb.mxu0 %v1268_v30  ;;  %235 = vmatpush.msrb.mxu1 %v1237_v25 }
  0x31   :  { %263 = vmatpush.msrb.mxu2 %v1273_v31  ;;  %203 = vmatpush.msrb.mxu3 %v1396_v52 }
  0x32   :  { %217 = vmatpush.msrb.mxu0 %v1292_v34  ;;  %236 = vmatpush.msrb.mxu1 %v1261_v29 }
  0x33   :  { %264 = vmatpush.msrb.mxu2 %v1297_v35  ;;  %971 = vmatmul.msk.f32.vlgmr.msra.gmra.mxu3 %vm85_vm1, %v81_v60  ;;  %v980_v60 = vld [vmem:[%s2186_s1 + $0x30] sm:$0xff] }
  0x34   :  { %148 = vmatmul.f32.vlgmr.msra.gmra.mxu2 %v80_v59  ;;  %204 = vmatpush.msrb.mxu3 %v1418_v56  ;;  %v1520_v59 = vld.sshfl [vmem:[#allocation1 + $0x8] sm:$0xff pattern:$0x75316420] }
  0x35   :  { %287 = vmatpush.msra.mxu2 %v1091_v0  ;;  %218 = vmatpush.msrb.mxu0 %v1316_v38  ;;  %373 = vst [vmem:[#allocation1] ss:$2 sm:$0xff] %v980_v60 }
  0x36   :  { %237 = vmatpush.msrb.mxu1 %v1285_v33  ;;  %307 = vmatpush.msra.mxu3 %v1108_v3 }
  0x37   :  { %288 = vmatpush.msra.mxu2 %v1101_v2  ;;  %219 = vmatpush.msrb.mxu0 %v1335_v41 }
  0x38   :  { %238 = vmatpush.msrb.mxu1 %v1309_v37  ;;  %108 = vmatmul.f32.vlgmr.msra.gmra.mxu0 %v1437_v62  ;;  %v2201_v62 = vld [vmem:[#allocation5_spill] sm:$0xff] }
  0x39   :  { %128 = vmatmul.f32.vlgmr.msra.gmra.mxu1 %v79_v63  ;;  %289 = vmatpush.msra.mxu2 %v1126_v6  ;;  %v1546_v63 = vld.sshfl [vmem:[#allocation1 + $0x10] sm:$0xff pattern:$0x75316420] }
  0x3a   :  { %308 = vmatpush.msra.mxu3 %v1131_v7  ;;  %220 = vmatpush.msrb.mxu0 %v1360_v46 }
  0x3b   :  { %239 = vmatpush.msrb.mxu1 %v1328_v40  ;;  %290 = vmatpush.msra.mxu2 %v1155_v11 }
  0x3c   :  { %309 = vmatpush.msra.mxu3 %v1148_v10  ;;  %221 = vmatpush.msrb.mxu0 %v1379_v49  ;;  %v1604_v60 = vld.sshfl [vmem:[#allocation1] sm:$0xff pattern:$0x75316420] }
  0x3d   :  { %240 = vmatpush.msrb.mxu1 %v1353_v45  ;;  %205 = vmatmul.f32.vlgmr.msrb.gmra.mxu3 %v180_v58  ;;  %v377_v58 = vld.sshfl [vmem:[#allocation1 + $0x8] sm:$0xff pattern:$0x75316420] }
  0x3e   :  { %291 = vmatpush.msra.mxu2 %v1184_v16  ;;  %310 = vmatpush.msra.mxu3 %v1172_v14 }
  0x3f   :  { %222 = vmatpush.msrb.mxu0 %v1403_v53  ;;  %241 = vmatpush.msrb.mxu1 %v1372_v48 }
  0x40   :  { %292 = vmatpush.msra.mxu2 %v1208_v20  ;;  %311 = vmatpush.msra.mxu3 %v1196_v18 }
  0x41   :  { %223 = vmatpush.msrb.mxu0 %v1423_v57  ;;  %242 = vmatpush.msrb.mxu1 %v1391_v51 }
  0x42   :  { %975 = vmatmul.msk.f32.vlgmr.msrb.gmra.mxu2 %vm85_vm1, %v1464_v55  ;;  %312 = vmatpush.msra.mxu3 %v1220_v22  ;;  %v981_v55 = vld [vmem:[%s2186_s1 + $0x38] sm:$0xff] }
  0x43   :  { %293 = vmatpush.msra.mxu2 %v1232_v24  ;;  %224 = vmatpush.msrb.mxu0 %v1446_v42 }
  0x44   :  { %243 = vmatpush.msrb.mxu1 %v1408_v54  ;;  %225 = vmatmul.f32.vlgmr.msrb.gmra.mxu0 %v1468_v5  ;;  %v1551_v5 = vld.sshfl [vmem:[#allocation1 + $0x18] sm:$0xff pattern:$0x75316420] }
  0x45   :  { %294 = vmatpush.msra.mxu2 %v1256_v28  ;;  %313 = vmatpush.msra.mxu3 %v1244_v26  ;;  %375 = vst [vmem:[#allocation1 + $0x10] ss:$2 sm:$0xff] %v981_v55 }
  0x46   :  { %327 = vmatpush.msra.mxu0 %v1096_v1  ;;  %244 = vmatpush.msrb.mxu1 %v1435_v61 }
  0x47   :  { %295 = vmatpush.msra.mxu2 %v2201_v62  ;;  %245 = vmatmul.f32.vlgmr.msrb.gmra.mxu1 %v1472_v9  ;;  %v2203_v9 = vld [vmem:[#allocation3_spill] sm:$0xff] }
  0x48   :  { %314 = vmatpush.msra.mxu3 %v1268_v30  ;;  %328 = vmatpush.msra.mxu0 %v1113_v4 }
  0x49   :  { %978 = vmatpush.msk.msra.mxu1 %vm88_vm0, %v2202_v43  ;;  %296 = vmatpush.msra.mxu2 %v1304_v36 }
  0x4a   :  { %315 = vmatpush.msra.mxu3 %v1292_v34  ;;  %329 = vmatpush.msra.mxu0 %v1136_v8 }
  0x4b   :  { %355 = vmatpush.msra.mxu1 %v2203_v9  ;;  %297 = vmatpush.msra.mxu2 %v1323_v39 }
  0x4c   :  { %316 = vmatpush.msra.mxu3 %v1316_v38  ;;  %330 = vmatpush.msra.mxu0 %v1160_v12  ;;  %v1617_v55 = vld.sshfl [vmem:[#allocation1 + $0x18] sm:$0xff pattern:$0x75316420] }
  0x4d   :  { %356 = vmatpush.msra.mxu1 %v1165_v13  ;;  %298 = vmatpush.msra.mxu2 %v1348_v44 }
  0x4e   :  { %317 = vmatpush.msra.mxu3 %v1335_v41  ;;  %331 = vmatpush.msra.mxu0 %v1189_v17 }
  0x4f   :  { %357 = vmatpush.msra.mxu1 %v1177_v15  ;;  %299 = vmatpush.msra.mxu2 %v1367_v47 }
  0x50   :  { %318 = vmatpush.msra.mxu3 %v1360_v46  ;;  %332 = vmatpush.msra.mxu0 %v1213_v21 }
  0x51   :  { %358 = vmatpush.msra.mxu1 %v1201_v19  ;;  %300 = vmatpush.msra.mxu2 %v1386_v50 }
  0x52   :  { %319 = vmatpush.msra.mxu3 %v1379_v49  ;;  %333 = vmatpush.msra.mxu0 %v1237_v25 }
  0x53   :  { %359 = vmatpush.msra.mxu1 %v1225_v23  ;;  %301 = vmatpush.msra.mxu2 %v1396_v52 }
  0x54   :  { %320 = vmatpush.msra.mxu3 %v1403_v53  ;;  %334 = vmatpush.msra.mxu0 %v1261_v29 }
  0x55   :  { %360 = vmatpush.msra.mxu1 %v1249_v27  ;;  %302 = vmatpush.msra.mxu2 %v1418_v56 }
  0x56   :  { %321 = vmatpush.msra.mxu3 %v1423_v57  ;;  %335 = vmatpush.msra.mxu0 %v1285_v33 }
  0x57   :  { %361 = vmatpush.msra.mxu1 %v1273_v31  ;;  %405 = vmatpush.msrb.mxu2 %v1108_v3 }
  0x58   :  { %322 = vmatpush.msra.mxu3 %v1446_v42  ;;  %336 = vmatpush.msra.mxu0 %v1309_v37 }
  0x59   :  { %362 = vmatpush.msra.mxu1 %v1297_v35  ;;  %406 = vmatpush.msrb.mxu2 %v1131_v7 }
  0x5a   :  { %425 = vmatpush.msrb.mxu3 %v1096_v1  ;;  %337 = vmatpush.msra.mxu0 %v1328_v40 }
  0x5b   :  { %385 = vmatpush.msrb.mxu1 %v1091_v0  ;;  %407 = vmatpush.msrb.mxu2 %v1148_v10 }
  0x5c   :  { %426 = vmatpush.msrb.mxu3 %v1113_v4  ;;  %338 = vmatpush.msra.mxu0 %v1353_v45 }
  0x5d   :  { %386 = vmatpush.msrb.mxu1 %v1101_v2  ;;  %303 = vmatmul.f32.vlgmr.msra.gmra.mxu2 %v1517_v32  ;;  %v984_v32 = vld [vmem:[%s2186_s1 + $0x40] sm:$0xff] }
  0x5e   :  { %323 = vmatmul.f32.vlgmr.msra.gmra.mxu3 %v1520_v59  ;;  %408 = vmatpush.msrb.mxu2 %v1172_v14  ;;  %471 = vst [vmem:[#allocation1] ss:$2 sm:$0xff] %v984_v32  ;;  %v378_v59 = vld.sshfl [vmem:[#allocation1 + $0x10] sm:$0xff pattern:$0x75316420] }
  0x5f   :  { %387 = vmatpush.msrb.mxu1 %v1126_v6  ;;  %427 = vmatpush.msrb.mxu3 %v1136_v8 }
  0x60   :  { %339 = vmatpush.msra.mxu0 %v1372_v48  ;;  %409 = vmatpush.msrb.mxu2 %v1196_v18  ;;  %v985_v18 = vld [vmem:[%s2186_s1 + $0x48] sm:$0xff] }
  0x61   :  { %388 = vmatpush.msrb.mxu1 %v1155_v11  ;;  %428 = vmatpush.msrb.mxu3 %v1160_v12  ;;  %473 = vst [vmem:[#allocation1 + $0x10] ss:$2 sm:$0xff] %v985_v18  ;;  %v2204_v18 = vld [vmem:[#allocation4_spill] sm:$0xff] }
  0x62   :  { %340 = vmatpush.msra.mxu0 %v1391_v51  ;;  %410 = vmatpush.msrb.mxu2 %v1220_v22 }
  0x63   :  { %389 = vmatpush.msrb.mxu1 %v1184_v16  ;;  %429 = vmatpush.msrb.mxu3 %v1189_v17 }
  0x64   :  { %341 = vmatpush.msra.mxu0 %v1408_v54  ;;  %411 = vmatpush.msrb.mxu2 %v1244_v26 }
  0x65   :  { %390 = vmatpush.msrb.mxu1 %v1208_v20  ;;  %430 = vmatpush.msrb.mxu3 %v1213_v21 }
  0x66   :  { %342 = vmatpush.msra.mxu0 %v1435_v61  ;;  %412 = vmatpush.msrb.mxu2 %v1268_v30 }
  0x67   :  { %343 = vmatmul.f32.vlgmr.msra.gmra.mxu0 %v1546_v63  ;;  %391 = vmatpush.msrb.mxu1 %v1232_v24  ;;  %v474_v63 = vld.sshfl [vmem:[#allocation1] sm:$0xff pattern:$0x75316420] }
  0x68   :  { %431 = vmatpush.msrb.mxu3 %v1237_v25  ;;  %982 = vmatpush.msk.msrb.mxu0 %vm88_vm0, %v2202_v43  ;;  %v477_v32 = vld.sshfl [vmem:[#allocation1 + $0x18] sm:$0xff pattern:$0x75316420] }
  0x69   :  { %979 = vmatmul.msk.f32.vlgmr.msra.gmra.mxu1 %vm85_vm1, %v1551_v5  ;;  %413 = vmatpush.msrb.mxu2 %v1292_v34  ;;  %v475_v5 = vld.sshfl [vmem:[#allocation1 + $0x8] sm:$0xff pattern:$0x75316420] }
  0x6a   :  { %392 = vmatpush.msrb.mxu1 %v1256_v28  ;;  %432 = vmatpush.msrb.mxu3 %v1261_v29 }
  0x6b   :  { %453 = vmatpush.msrb.mxu0 %v2203_v9  ;;  %414 = vmatpush.msrb.mxu2 %v1316_v38 }
  0x6c   :  { %393 = vmatpush.msrb.mxu1 %v2201_v62  ;;  %433 = vmatpush.msrb.mxu3 %v1285_v33 }
  0x6d   :  { %454 = vmatpush.msrb.mxu0 %v1165_v13  ;;  %415 = vmatpush.msrb.mxu2 %v1335_v41 }
  0x6e   :  { %394 = vmatpush.msrb.mxu1 %v1304_v36  ;;  %434 = vmatpush.msrb.mxu3 %v1309_v37 }
  0x6f   :  { %455 = vmatpush.msrb.mxu0 %v1177_v15  ;;  %416 = vmatpush.msrb.mxu2 %v1360_v46 }
  0x70   :  { %395 = vmatpush.msrb.mxu1 %v1323_v39  ;;  %435 = vmatpush.msrb.mxu3 %v1328_v40 }
  0x71   :  { %456 = vmatpush.msrb.mxu0 %v1201_v19  ;;  %417 = vmatpush.msrb.mxu2 %v1379_v49 }
  0x72   :  { %396 = vmatpush.msrb.mxu1 %v1348_v44  ;;  %436 = vmatpush.msrb.mxu3 %v1353_v45 }
  0x73   :  { %457 = vmatpush.msrb.mxu0 %v1225_v23  ;;  %418 = vmatpush.msrb.mxu2 %v1403_v53 }
  0x74   :  { %397 = vmatpush.msrb.mxu1 %v1367_v47  ;;  %437 = vmatpush.msrb.mxu3 %v1372_v48 }
  0x75   :  { %458 = vmatpush.msrb.mxu0 %v1249_v27  ;;  %419 = vmatpush.msrb.mxu2 %v1423_v57 }
  0x76   :  { %398 = vmatpush.msrb.mxu1 %v1386_v50  ;;  %438 = vmatpush.msrb.mxu3 %v1391_v51 }
  0x77   :  { %459 = vmatpush.msrb.mxu0 %v1273_v31  ;;  %420 = vmatpush.msrb.mxu2 %v1446_v42 }
  0x78   :  { %399 = vmatpush.msrb.mxu1 %v1396_v52  ;;  %439 = vmatpush.msrb.mxu3 %v1408_v54 }
  0x79   :  { %460 = vmatpush.msrb.mxu0 %v1297_v35  ;;  %421 = vmatmul.f32.vlgmr.msrb.gmra.mxu2 %v377_v58  ;;  %v988_v58 = vld [vmem:[%s2186_s1 + $0x50] sm:$0xff] }
  0x7a   :  { %523 = vmatpush.msra.mxu2 %v1096_v1  ;;  %400 = vmatpush.msrb.mxu1 %v1418_v56  ;;  %569 = vst [vmem:[#allocation1] ss:$2 sm:$0xff] %v988_v58  ;;  %v1037_v58 = vld [vmem:[%s2185_s0 + $0x1a8] sm:$0xff] }
  0x7b   :  { %483 = vmatpush.msra.mxu0 %v1091_v0  ;;  %440 = vmatpush.msrb.mxu3 %v1435_v61 }
  0x7c   :  { %441 = vmatmul.f32.vlgmr.msrb.gmra.mxu3 %v378_v59  ;;  %503 = vmatpush.msra.mxu1 %v1108_v3  ;;  %v989_v59 = vld [vmem:[%s2186_s1 + $0x58] sm:$0xff] }
  0x7d   :  { %484 = vmatpush.msra.mxu0 %v1101_v2  ;;  %524 = vmatpush.msra.mxu2 %v1113_v4 }
  0x7e   :  { %986 = vmatpush.msk.msra.mxu3 %vm88_vm0, %v2202_v43  ;;  %504 = vmatpush.msra.mxu1 %v1131_v7 }
  0x7f   :  { %485 = vmatpush.msra.mxu0 %v1126_v6  ;;  %525 = vmatpush.msra.mxu2 %v1136_v8 }
  0x80   :  { %551 = vmatpush.msra.mxu3 %v2203_v9  ;;  %401 = vmatmul.f32.vlgmr.msrb.gmra.mxu1 %v1604_v60  ;;  %v476_v60 = vld.sshfl [vmem:[#allocation1 + $0x10] sm:$0xff pattern:$0x75316420] }
  0x81   :  { %486 = vmatpush.msra.mxu0 %v1155_v11  ;;  %505 = vmatpush.msra.mxu1 %v1148_v10  ;;  %571 = vst [vmem:[#allocation1 + $0x10] ss:$2 sm:$0xff] %v989_v59  ;;  %v1054_v59 = vld [vmem:[%s2185_s0 + $0x20] sm:$0xff] }
  0x82   :  { %526 = vmatpush.msra.mxu2 %v1160_v12  ;;  %552 = vmatpush.msra.mxu3 %v1165_v13 }
  0x83   :  { %487 = vmatpush.msra.mxu0 %v1184_v16  ;;  %506 = vmatpush.msra.mxu1 %v1172_v14 }
  0x84   :  { %527 = vmatpush.msra.mxu2 %v1189_v17  ;;  %553 = vmatpush.msra.mxu3 %v1177_v15 }
  0x85   :  { %983 = vmatmul.msk.f32.vlgmr.msrb.gmra.mxu0 %vm85_vm1, %v1617_v55  ;;  %507 = vmatpush.msra.mxu1 %v2204_v18  ;;  %v572_v55 = vld.sshfl [vmem:[#allocation1] sm:$0xff pattern:$0x75316420] }
  0x86   :  { %488 = vmatpush.msra.mxu0 %v1208_v20  ;;  %528 = vmatpush.msra.mxu2 %v1213_v21 }
  0x87   :  { %554 = vmatpush.msra.mxu3 %v1201_v19  ;;  %508 = vmatpush.msra.mxu1 %v1220_v22 }
  0x88   :  { %489 = vmatpush.msra.mxu0 %v1232_v24  ;;  %529 = vmatpush.msra.mxu2 %v1237_v25 }
  0x89   :  { %555 = vmatpush.msra.mxu3 %v1225_v23  ;;  %509 = vmatpush.msra.mxu1 %v1244_v26 }
  0x8a   :  { %490 = vmatpush.msra.mxu0 %v1256_v28  ;;  %530 = vmatpush.msra.mxu2 %v1261_v29 }
  0x8b   :  { %556 = vmatpush.msra.mxu3 %v1249_v27  ;;  %510 = vmatpush.msra.mxu1 %v1268_v30 }
  0x8c   :  { %491 = vmatpush.msra.mxu0 %v2201_v62  ;;  %531 = vmatpush.msra.mxu2 %v1285_v33 }
  0x8d   :  { %557 = vmatpush.msra.mxu3 %v1273_v31  ;;  %511 = vmatpush.msra.mxu1 %v1292_v34 }
  0x8e   :  { %492 = vmatpush.msra.mxu0 %v1304_v36  ;;  %532 = vmatpush.msra.mxu2 %v1309_v37 }
  0x8f   :  { %558 = vmatpush.msra.mxu3 %v1297_v35  ;;  %512 = vmatpush.msra.mxu1 %v1316_v38 }
  0x90   :  { %493 = vmatpush.msra.mxu0 %v1323_v39  ;;  %533 = vmatpush.msra.mxu2 %v1328_v40 }
  0x91   :  { %581 = vmatpush.msrb.mxu3 %v1091_v0  ;;  %513 = vmatpush.msra.mxu1 %v1335_v41 }
  0x92   :  { %494 = vmatpush.msra.mxu0 %v1348_v44  ;;  %534 = vmatpush.msra.mxu2 %v1353_v45 }
  0x93   :  { %582 = vmatpush.msrb.mxu3 %v1101_v2  ;;  %514 = vmatpush.msra.mxu1 %v1360_v46 }
  0x94   :  { %495 = vmatpush.msra.mxu0 %v1367_v47  ;;  %535 = vmatpush.msra.mxu2 %v1372_v48 }
  0x95   :  { %583 = vmatpush.msrb.mxu3 %v1126_v6  ;;  %515 = vmatpush.msra.mxu1 %v1379_v49 }
  0x96   :  { %496 = vmatpush.msra.mxu0 %v1386_v50  ;;  %536 = vmatpush.msra.mxu2 %v1391_v51 }
  0x97   :  { %584 = vmatpush.msrb.mxu3 %v1155_v11  ;;  %516 = vmatpush.msra.mxu1 %v1403_v53 }
  0x98   :  { %497 = vmatpush.msra.mxu0 %v1396_v52  ;;  %537 = vmatpush.msra.mxu2 %v1408_v54 }
  0x99   :  { %585 = vmatpush.msrb.mxu3 %v1184_v16  ;;  %517 = vmatpush.msra.mxu1 %v1423_v57 }
  0x9a   :  { %498 = vmatpush.msra.mxu0 %v1418_v56  ;;  %538 = vmatpush.msra.mxu2 %v1435_v61 }
  0x9b   :  { %586 = vmatpush.msrb.mxu3 %v1208_v20  ;;  %539 = vmatmul.f32.vlgmr.msra.gmra.mxu2 %v476_v60 }
  0x9c   :  { %601 = vmatpush.msrb.mxu0 %v1108_v3  ;;  %990 = vmatpush.msk.msrb.mxu2 %vm88_vm0, %v2202_v43 }
  0x9d   :  { %587 = vmatpush.msrb.mxu3 %v1232_v24  ;;  %518 = vmatpush.msra.mxu1 %v1446_v42 }
  0x9e   :  { %987 = vmatmul.msk.f32.vlgmr.msra.gmra.mxu3 %vm85_vm1, %v477_v32  ;;  %602 = vmatpush.msrb.mxu0 %v1131_v7  ;;  %v1053_v32 = vld [vmem:[%s2185_s0 + $0x118] sm:$0xff] }
  0x9f   :  { %588 = vmatpush.msrb.mxu3 %v1256_v28  ;;  %621 = vmatpush.msrb.mxu1 %v1096_v1 }
  0xa0   :  { %649 = vmatpush.msrb.mxu2 %v2203_v9  ;;  %499 = vmatmul.f32.vlgmr.msra.gmra.mxu0 %v474_v63  ;;  %v573_v63 = vld.sshfl [vmem:[#allocation1 + $0x8] sm:$0xff pattern:$0x75316420] }
  0xa1   :  { %519 = vmatmul.f32.vlgmr.msra.gmra.mxu1 %v475_v5  ;;  %589 = vmatpush.msrb.mxu3 %v2201_v62  ;;  %v992_v5 = vld [vmem:[%s2186_s1 + $0x60] sm:$0xff] }
  0xa2   :  { %603 = vmatpush.msrb.mxu0 %v1148_v10  ;;  %622 = vmatpush.msrb.mxu1 %v1113_v4  ;;  %667 = vst [vmem:[#allocation1] ss:$2 sm:$0xff] %v992_v5  ;;  %v1057_v5 = vld [vmem:[%s2185_s0 + $0x18] sm:$0xff] }
  0xa3   :  { %650 = vmatpush.msrb.mxu2 %v1165_v13  ;;  %590 = vmatpush.msrb.mxu3 %v1304_v36 }
  0xa4   :  { %604 = vmatpush.msrb.mxu0 %v1172_v14  ;;  %623 = vmatpush.msrb.mxu1 %v1136_v8 }
  0xa5   :  { %651 = vmatpush.msrb.mxu2 %v1177_v15  ;;  %591 = vmatpush.msrb.mxu3 %v1323_v39 }
  0xa6   :  { %605 = vmatpush.msrb.mxu0 %v2204_v18  ;;  %624 = vmatpush.msrb.mxu1 %v1160_v12 }
  0xa7   :  { %652 = vmatpush.msrb.mxu2 %v1201_v19  ;;  %592 = vmatpush.msrb.mxu3 %v1348_v44 }
  0xa8   :  { %606 = vmatpush.msrb.mxu0 %v1220_v22  ;;  %625 = vmatpush.msrb.mxu1 %v1189_v17 }
  0xa9   :  { %653 = vmatpush.msrb.mxu2 %v1225_v23  ;;  %593 = vmatpush.msrb.mxu3 %v1367_v47 }
  0xaa   :  { %607 = vmatpush.msrb.mxu0 %v1244_v26  ;;  %626 = vmatpush.msrb.mxu1 %v1213_v21 }
  0xab   :  { %654 = vmatpush.msrb.mxu2 %v1249_v27  ;;  %594 = vmatpush.msrb.mxu3 %v1386_v50 }
  0xac   :  { %608 = vmatpush.msrb.mxu0 %v1268_v30  ;;  %627 = vmatpush.msrb.mxu1 %v1237_v25 }
  0xad   :  { %655 = vmatpush.msrb.mxu2 %v1273_v31  ;;  %595 = vmatpush.msrb.mxu3 %v1396_v52 }
  0xae   :  { %609 = vmatpush.msrb.mxu0 %v1292_v34  ;;  %628 = vmatpush.msrb.mxu1 %v1261_v29 }
  0xaf   :  { %656 = vmatpush.msrb.mxu2 %v1297_v35  ;;  %596 = vmatpush.msrb.mxu3 %v1418_v56 }
  0xb0   :  { %610 = vmatpush.msrb.mxu0 %v1316_v38  ;;  %629 = vmatpush.msrb.mxu1 %v1285_v33 }
  0xb1   :  { %679 = vmatpush.msra.mxu2 %v1091_v0  ;;  %699 = vmatpush.msra.mxu3 %v1108_v3  ;;  %v575_v0 = vld.sshfl [vmem:[#allocation1 + $0x18] sm:$0xff pattern:$0x75316420]  ;;  %v993_v3 = vld [vmem:[%s2186_s1 + $0x68] sm:$0xff] }
  0xb2   :  { %611 = vmatpush.msrb.mxu0 %v1335_v41  ;;  %630 = vmatpush.msrb.mxu1 %v1309_v37 }
  0xb3   :  { %680 = vmatpush.msra.mxu2 %v1101_v2  ;;  %700 = vmatpush.msra.mxu3 %v1131_v7  ;;  %v574_v2 = vld.sshfl [vmem:[#allocation1 + $0x10] sm:$0xff pattern:$0x75316420] }
  0xb4   :  { %612 = vmatpush.msrb.mxu0 %v1360_v46  ;;  %631 = vmatpush.msrb.mxu1 %v1328_v40  ;;  %669 = vst [vmem:[#allocation1 + $0x10] ss:$2 sm:$0xff] %v993_v3  ;;  %v1059_v3 = vld [vmem:[%s2185_s0 + $0x108] sm:$0xff] }
  0xb5   :  { %681 = vmatpush.msra.mxu2 %v1126_v6  ;;  %701 = vmatpush.msra.mxu3 %v1148_v10  ;;  %v996_v6 = vld [vmem:[%s2186_s1 + $0x70] sm:$0xff]  ;;  %v997_v10 = vld [vmem:[%s2186_s1 + $0x78] sm:$0xff] }
  0xb6   :  { %613 = vmatpush.msrb.mxu0 %v1379_v49  ;;  %632 = vmatpush.msrb.mxu1 %v1353_v45 }
  0xb7   :  { %682 = vmatpush.msra.mxu2 %v1155_v11  ;;  %597 = vmatmul.f32.vlgmr.msrb.gmra.mxu3 %v572_v55  ;;  %v1860_v11 = vld [vmem:[%s2185_s0 + $0xf8] sm:$0xff]  ;;  %v1055_v55 = vld [vmem:[%s2185_s0 + $0xa0] sm:$0xff] }
  0xb8   :  { %702 = vmatpush.msra.mxu3 %v1172_v14  ;;  %614 = vmatpush.msrb.mxu0 %v1403_v53  ;;  %v1883_v14 = vld [vmem:[%s2185_s0 + $0x78] sm:$0xff] }
  0xb9   :  { %683 = vmatpush.msra.mxu2 %v1184_v16  ;;  %633 = vmatpush.msrb.mxu1 %v1372_v48  ;;  %v1895_v16 = vld [vmem:[%s2185_s0 + $0x170] sm:$0xff] }
  0xba   :  { %703 = vmatpush.msra.mxu3 %v2204_v18  ;;  %615 = vmatpush.msrb.mxu0 %v1423_v57 }
  0xbb   :  { %684 = vmatpush.msra.mxu2 %v1208_v20  ;;  %634 = vmatpush.msrb.mxu1 %v1391_v51  ;;  %v1839_v7 = vld.sshfl [vmem:[#allocation1 + $0x10] sm:$0xff pattern:$0x75316420]  ;;  %v1914_v20 = vld [vmem:[%s2185_s0 + $0x168] sm:$0xff] }
  0xbc   :  { %991 = vmatmul.msk.f32.vlgmr.msrb.gmra.mxu2 %vm85_vm1, %v575_v0  ;;  %704 = vmatpush.msra.mxu3 %v1220_v22  ;;  %v1927_v22 = vld [vmem:[%s2185_s0 + $0xd8] sm:$0xff] }
  0xbd   :  { %685 = vmatpush.msra.mxu2 %v1232_v24  ;;  %616 = vmatpush.msrb.mxu0 %v1446_v42  ;;  %v1940_v24 = vld [vmem:[%s2185_s0 + $0x60] sm:$0xff]  ;;  %v1058_v0 = vld [vmem:[%s2185_s0 + $0x98] sm:$0xff] }
  0xbe   :  { %635 = vmatpush.msrb.mxu1 %v1408_v54  ;;  %617 = vmatmul.f32.vlgmr.msrb.gmra.mxu0 %v573_v63  ;;  %v1056_v63 = vld [vmem:[%s2185_s0 + $0x110] sm:$0xff] }
  0xbf   :  { %686 = vmatpush.msra.mxu2 %v1256_v28  ;;  %705 = vmatpush.msra.mxu3 %v1244_v26  ;;  %v1959_v28 = vld [vmem:[%s2185_s0 + $0x58] sm:$0xff] }
  0xc0   :  { %719 = vmatpush.msra.mxu0 %v1096_v1  ;;  %636 = vmatpush.msrb.mxu1 %v1435_v61  ;;  %v670_v1 = vld.sshfl [vmem:[#allocation1] sm:$0xff pattern:$0x75316420] }
  0xc1   :  { %687 = vmatpush.msra.mxu2 %v2201_v62  ;;  %637 = vmatmul.f32.vlgmr.msrb.gmra.mxu1 %v574_v2  ;;  %v2009_v62 = vld [vmem:[%s2185_s0 + $0x40] sm:$0xff] }
  0xc2   :  { %706 = vmatpush.msra.mxu3 %v1268_v30  ;;  %720 = vmatpush.msra.mxu0 %v1113_v4  ;;  %v671_v4 = vld.sshfl [vmem:[#allocation1 + $0x8] sm:$0xff pattern:$0x75316420]  ;;  %v956_v2 = vld [vmem:[%s2187_s2] sm:$0xf] }
  0xc3   :  { %688 = vmatpush.msra.mxu2 %v1304_v36  ;;  %994 = vmatpush.msk.msra.mxu1 %vm88_vm0, %v2202_v43  ;;  %765 = vst [vmem:[#allocation1] ss:$2 sm:$0xff] %v996_v6  ;;  %v2022_v43 = vld [vmem:[%s2185_s0 + $0x1b8] sm:$0xff]  ;;  %v1060_v6 = vld [vmem:[%s2185_s0 + $0x10] sm:$0xff] }
  0xc4   :  { %707 = vmatpush.msra.mxu3 %v1292_v34  ;;  %721 = vmatpush.msra.mxu0 %v1136_v8  ;;  %v1843_v8 = vld.sshfl [vmem:[#allocation1 + $0x18] sm:$0xff pattern:$0x75316420] }
  0xc5   :  { %689 = vmatpush.msra.mxu2 %v1323_v39  ;;  %747 = vmatpush.msra.mxu1 %v2203_v9  ;;  %767 = vst [vmem:[#allocation1 + $0x10] ss:$2 sm:$0xff] %v997_v10  ;;  %v2028_v9 = vld [vmem:[%s2185_s0 + $0x38] sm:$0xff]  ;;  %v1063_v10 = vld [vmem:[%s2185_s0 + $0x8] sm:$0xff] }
  0xc6   :  { %708 = vmatpush.msra.mxu3 %v1316_v38  ;;  %722 = vmatpush.msra.mxu0 %v1160_v12  ;;  %v1869_v12 = vld [vmem:[%s2185_s0 + $0xf0] sm:$0xff] }
  0xc7   :  { %690 = vmatpush.msra.mxu2 %v1348_v44  ;;  %748 = vmatpush.msra.mxu1 %v1165_v13  ;;  %v1875_v13 = vld [vmem:[%s2185_s0 + $0x178] sm:$0xff] }
  0xc8   :  { %709 = vmatpush.msra.mxu3 %v1335_v41  ;;  %723 = vmatpush.msra.mxu0 %v1189_v17  ;;  %v1902_v17 = vld [vmem:[%s2185_s0 + $0x70] sm:$0xff] }
  0xc9   :  { %691 = vmatpush.msra.mxu2 %v1367_v47  ;;  %749 = vmatpush.msra.mxu1 %v1177_v15  ;;  %v1889_v15 = vld [vmem:[%s2185_s0 + $0xe8] sm:$0xff] }
  0xca   :  { %710 = vmatpush.msra.mxu3 %v1360_v46  ;;  %724 = vmatpush.msra.mxu0 %v1213_v21  ;;  %v1921_v21 = vld [vmem:[%s2185_s0 + $0x68] sm:$0xff] }
  0xcb   :  { %692 = vmatpush.msra.mxu2 %v1386_v50  ;;  %750 = vmatpush.msra.mxu1 %v1201_v19  ;;  %v1908_v19 = vld [vmem:[%s2185_s0 + $0xe0] sm:$0xff] }
  0xcc   :  { %711 = vmatpush.msra.mxu3 %v1379_v49  ;;  %725 = vmatpush.msra.mxu0 %v1237_v25  ;;  %v1946_v25 = vld [vmem:[%s2185_s0 + $0xd0] sm:$0xff] }
  0xcd   :  { %693 = vmatpush.msra.mxu2 %v1396_v52  ;;  %751 = vmatpush.msra.mxu1 %v1225_v23  ;;  %v1933_v23 = vld [vmem:[%s2185_s0 + $0x160] sm:$0xff]  ;;  %v770_v18 = vld.sshfl [vmem:[#allocation1 + $0x10] sm:$0xff pattern:$0x75316420] }
  0xce   :  { %712 = vmatpush.msra.mxu3 %v1403_v53  ;;  %726 = vmatpush.msra.mxu0 %v1261_v29  ;;  %v1966_v29 = vld [vmem:[%s2185_s0 + $0x150] sm:$0xff] }
  0xcf   :  { %694 = vmatpush.msra.mxu2 %v1418_v56  ;;  %752 = vmatpush.msra.mxu1 %v1249_v27  ;;  %v1952_v27 = vld [vmem:[%s2185_s0 + $0x158] sm:$0xff] }
  0xd0   :  { %713 = vmatpush.msra.mxu3 %v1423_v57  ;;  %727 = vmatpush.msra.mxu0 %v1285_v33  ;;  %v1989_v33 = vld [vmem:[%s2185_s0 + $0x48] sm:$0xff] }
  0xd1   :  { %797 = vmatpush.msrb.mxu2 %v1860_v11  ;;  %753 = vmatpush.msra.mxu1 %v1273_v31  ;;  %v1973_v31 = vld [vmem:[%s2185_s0 + $0x50] sm:$0xff] }
  0xd2   :  { %714 = vmatpush.msra.mxu3 %v1446_v42  ;;  %728 = vmatpush.msra.mxu0 %v1309_v37 }
  0xd3   :  { %798 = vmatpush.msrb.mxu2 %v1869_v12  ;;  %754 = vmatpush.msra.mxu1 %v1297_v35  ;;  %v2002_v35 = vld [vmem:[%s2185_s0 + $0x1c0] sm:$0x3] }
  0xd4   :  { %817 = vmatpush.msrb.mxu3 %v1875_v13  ;;  %729 = vmatpush.msra.mxu0 %v1328_v40 }
  0xd5   :  { %777 = vmatpush.msrb.mxu1 %v1883_v14  ;;  %799 = vmatpush.msrb.mxu2 %v1889_v15 }
  0xd6   :  { %818 = vmatpush.msrb.mxu3 %v1895_v16  ;;  %730 = vmatpush.msra.mxu0 %v1353_v45 }
  0xd7   :  { %695 = vmatmul.f32.vlgmr.msra.gmra.mxu2 %v670_v1  ;;  %715 = vmatmul.f32.vlgmr.msra.gmra.mxu3 %v671_v4  ;;  %v1067_v4 = vmov 0  }
  0xd8   :  { %778 = vmatpush.msrb.mxu1 %v1902_v17  ;;  %800 = vmatpush.msrb.mxu2 %v1908_v19 }
  0xd9   :  { %819 = vmatpush.msrb.mxu3 %v1914_v20  ;;  %731 = vmatpush.msra.mxu0 %v1372_v48 }
  0xda   :  { %779 = vmatpush.msrb.mxu1 %v1921_v21  ;;  %801 = vmatpush.msrb.mxu2 %v1927_v22 }
  0xdb   :  { %820 = vmatpush.msrb.mxu3 %v1933_v23  ;;  %732 = vmatpush.msra.mxu0 %v1391_v51 }
  0xdc   :  { %780 = vmatpush.msrb.mxu1 %v1940_v24  ;;  %802 = vmatpush.msrb.mxu2 %v1946_v25 }
  0xdd   :  { %821 = vmatpush.msrb.mxu3 %v1952_v27  ;;  %733 = vmatpush.msra.mxu0 %v1408_v54 }
  0xde   :  { %781 = vmatpush.msrb.mxu1 %v1959_v28  ;;  %803 = vmatpush.msrb.mxu2 %v1244_v26  ;;  %v1981_v26 = vld [vmem:[%s2185_s0 + $0x148] sm:$0xff] }
  0xdf   :  { %822 = vmatpush.msrb.mxu3 %v1966_v29  ;;  %734 = vmatpush.msra.mxu0 %v1435_v61 }
  0xe0   :  { %782 = vmatpush.msrb.mxu1 %v1973_v31  ;;  %735 = vmatmul.f32.vlgmr.msra.gmra.mxu0 %v1839_v7  ;;  %v1061_v7 = vld [vmem:[%s2185_s0 + $0x90] sm:$0xff] }
  0xe1   :  { %804 = vmatpush.msrb.mxu2 %v1268_v30  ;;  %823 = vmatpush.msrb.mxu3 %v1981_v26  ;;  %v1996_v30 = vld [vmem:[%s2185_s0 + $0x140] sm:$0xff] }
  0xe2   :  { %995 = vmatmul.msk.f32.vlgmr.msra.gmra.mxu1 %vm85_vm1, %v1843_v8  ;;  %998 = vmatpush.msk.msrb.mxu0 %vm88_vm0, %v2002_v35  ;;  %v1062_v8 = vld [vmem:[%s2185_s0 + $0x100] sm:$0xff] }
  0xe3   :  { %783 = vmatpush.msrb.mxu1 %v1989_v33  ;;  %805 = vmatpush.msrb.mxu2 %v1292_v34  ;;  %v2016_v34 = vld [vmem:[%s2185_s0 + $0x138] sm:$0xff] }
  0xe4   :  { %824 = vmatpush.msrb.mxu3 %v1996_v30  ;;  %845 = vmatpush.msrb.mxu0 %v2022_v43 }
  0xe5   :  { %784 = vmatpush.msrb.mxu1 %v2009_v62  ;;  %806 = vmatpush.msrb.mxu2 %v1316_v38  ;;  %v1036_v38 = vld [vmem:[%s2185_s0 + $0x1b0] sm:$0xff] }
  0xe6   :  { %825 = vmatpush.msrb.mxu3 %v2016_v34  ;;  %846 = vmatpush.msrb.mxu0 %v1036_v38 }
  0xe7   :  { %785 = vmatpush.msrb.mxu1 %v2028_v9  ;;  %807 = vmatpush.msrb.mxu2 %v1335_v41  ;;  %v771_v41 = vld.sshfl [vmem:[#allocation1 + $0x18] sm:$0xff pattern:$0x75316420] }
  0xe8   :  { %826 = vmatpush.msrb.mxu3 %v1309_v37  ;;  %847 = vmatpush.msrb.mxu0 %v1037_v58  ;;  %v1001_v37 = vld [vmem:[%s2186_s1 + $0x88] sm:$0xff] }
  0xe9   :  { %786 = vmatpush.msrb.mxu1 %v1304_v36  ;;  %808 = vmatpush.msrb.mxu2 %v1360_v46  ;;  %865 = vst [vmem:[#allocation1 + $0x10] ss:$2 sm:$0xff] %v1001_v37  ;;  %v1038_v36 = vld [vmem:[%s2185_s0 + $0x1a0] sm:$0xff] }
  0xea   :  { %827 = vmatpush.msrb.mxu3 %v1328_v40  ;;  %848 = vmatpush.msrb.mxu0 %v1038_v36  ;;  %v769_v40 = vld.sshfl [vmem:[#allocation1 + $0x8] sm:$0xff pattern:$0x75316420]  ;;  %v768_v46 = vld.sshfl [vmem:[#allocation1] sm:$0xff pattern:$0x75316420] }
  0xeb   :  { %787 = vmatpush.msrb.mxu1 %v1323_v39  ;;  %809 = vmatpush.msrb.mxu2 %v1379_v49  ;;  %v1039_v39 = vld [vmem:[%s2185_s0 + $0x198] sm:$0xff]  ;;  %v1043_v49 = vld [vmem:[%s2185_s0 + $0xc8] sm:$0xff] }
  0xec   :  { %828 = vmatpush.msrb.mxu3 %v1353_v45  ;;  %849 = vmatpush.msrb.mxu0 %v1039_v39  ;;  %v1000_v45 = vld [vmem:[%s2186_s1 + $0x80] sm:$0xff] }
  0xed   :  { %788 = vmatpush.msrb.mxu1 %v1348_v44  ;;  %810 = vmatpush.msrb.mxu2 %v1403_v53  ;;  %863 = vst [vmem:[#allocation1] ss:$2 sm:$0xff] %v1000_v45  ;;  %v1040_v44 = vld [vmem:[%s2185_s0 + $0x190] sm:$0xff]  ;;  %v1047_v53 = vld [vmem:[%s2185_s0 + $0x128] sm:$0xff] }
  0xee   :  { %829 = vmatpush.msrb.mxu3 %v1372_v48  ;;  %850 = vmatpush.msrb.mxu0 %v1040_v44  ;;  %v1042_v48 = vld [vmem:[%s2185_s0 + $0x180] sm:$0xff] }
  0xef   :  { %789 = vmatpush.msrb.mxu1 %v1367_v47  ;;  %811 = vmatpush.msrb.mxu2 %v1423_v57  ;;  %v1041_v47 = vld [vmem:[%s2185_s0 + $0x188] sm:$0xff]  ;;  %v1050_v57 = vld [vmem:[%s2185_s0 + $0x120] sm:$0xff] }
  0xf0   :  { %830 = vmatpush.msrb.mxu3 %v1391_v51  ;;  %851 = vmatpush.msrb.mxu0 %v1041_v47  ;;  %v1045_v51 = vld [vmem:[%s2185_s0 + $0x130] sm:$0xff]  ;;  %v869_v60 = vld.sshfl [vmem:[#allocation1 + $0x18] sm:$0xff pattern:$0x75316420] }
  0xf1   :  { %790 = vmatpush.msrb.mxu1 %v1386_v50  ;;  %812 = vmatpush.msrb.mxu2 %v1446_v42  ;;  %v1044_v50 = vld [vmem:[%s2185_s0 + $0xc0] sm:$0xff]  ;;  %v1052_v42 = vld [vmem:[%s2185_s0 + $0xa8] sm:$0xff]  ;;  %v868_v1 = vld.sshfl [vmem:[#allocation1 + $0x10] sm:$0xff pattern:$0x75316420] }
  0xf2   :  { %831 = vmatpush.msrb.mxu3 %v1408_v54  ;;  %813 = vmatmul.f32.vlgmr.msrb.gmra.mxu2 %v769_v40  ;;  %v1048_v54 = vld [vmem:[%s2185_s0 + $0x30] sm:$0xff] }
  0xf3   :  { %915 = vmatpush.msra.mxu2 %v1875_v13  ;;  %791 = vmatpush.msrb.mxu1 %v1396_v52  ;;  %v1046_v52 = vld [vmem:[%s2185_s0 + $0xb8] sm:$0xff] }
  0xf4   :  { %832 = vmatpush.msrb.mxu3 %v1435_v61  ;;  %852 = vmatpush.msrb.mxu0 %v1042_v48  ;;  %v1051_v61 = vld [vmem:[%s2185_s0 + $0x28] sm:$0xff] }
  0xf5   :  { %833 = vmatmul.f32.vlgmr.msrb.gmra.mxu3 %v770_v18  ;;  %916 = vmatpush.msra.mxu2 %v1895_v16  ;;  %v867_v13 = vld.sshfl [vmem:[#allocation1 + $0x8] sm:$0xff pattern:$0x75316420]  ;;  %v129_v16 = vpop.f32.mrf.mxu1 }
  0xf6   :  { %792 = vmatpush.msrb.mxu1 %v1418_v56  ;;  %875 = vmatpush.msra.mxu0 %v1883_v14  ;;  %v1049_v56 = vld [vmem:[%s2185_s0 + $0xb0] sm:$0xff]  ;;  %v1065_v14 = vld [vmem:[%s2185_s0] sm:$0xff] }
  0xf7   :  { %917 = vmatpush.msra.mxu2 %v1914_v20  ;;  %793 = vmatmul.f32.vlgmr.msrb.gmra.mxu1 %v768_v46  ;;  %v169_v20 = vpop.f32.mrf.mxu3 }
  0xf8   :  { %895 = vmatpush.msra.mxu1 %v1860_v11  ;;  %876 = vmatpush.msra.mxu0 %v1902_v17  ;;  %v866_v11 = vld.sshfl [vmem:[#allocation1] sm:$0xff pattern:$0x75316420]  ;;  %v149_v17 = vpop.f32.mrf.mxu2 }
  0xf9   :  { %918 = vmatpush.msra.mxu2 %v1933_v23  ;;  %999 = vmatmul.msk.f32.vlgmr.msrb.gmra.mxu0 %vm85_vm1, %v771_v41 }
  0xfa   :  { %896 = vmatpush.msra.mxu1 %v1869_v12  ;;  %877 = vmatpush.msra.mxu0 %v1921_v21  ;;  %v1064_v12 = vld [vmem:[%s2185_s0 + $0x88] sm:$0xff] }
  0xfb   :  { %919 = vmatpush.msra.mxu2 %v1952_v27  ;;  %1002 = vmatpush.msk.msra.mxu3 %vm88_vm0, %v2002_v35 }
  0xfc   :  { %897 = vmatpush.msra.mxu1 %v1889_v15  ;;  %878 = vmatpush.msra.mxu0 %v1940_v24  ;;  %v1066_v15 = vld [vmem:[%s2185_s0 + $0x80] sm:$0xff] }
  0xfd   :  { %920 = vmatpush.msra.mxu2 %v1966_v29  ;;  %943 = vmatpush.msra.mxu3 %v2022_v43  ;;  %v246_v21 = vpop.f32.mrf.mxu1 }
  0xfe   :  { %898 = vmatpush.msra.mxu1 %v1908_v19  ;;  %879 = vmatpush.msra.mxu0 %v1959_v28  ;;  %v109_v19 = vpop.f32.mrf.mxu0 }
  0xff   :  { %921 = vmatpush.msra.mxu2 %v1981_v26  ;;  %944 = vmatpush.msra.mxu3 %v1036_v38  ;;  %v206_v24 = vpop.f32.mrf.mxu3  ;;  %v130_v40 = vadd.f32 %v129_v16, %v109_v19 }
 0x100   :  { %899 = vmatpush.msra.mxu1 %v1927_v22  ;;  %880 = vmatpush.msra.mxu0 %v1973_v31  ;;  %v266_v22 = vpop.f32.mrf.mxu2 }
 0x101   :  { %922 = vmatpush.msra.mxu2 %v1996_v30  ;;  %945 = vmatpush.msra.mxu3 %v1037_v58 }
 0x102   :  { %900 = vmatpush.msra.mxu1 %v1946_v25  ;;  %881 = vmatpush.msra.mxu0 %v1989_v33 }
 0x103   :  { %923 = vmatpush.msra.mxu2 %v2016_v34  ;;  %946 = vmatpush.msra.mxu3 %v1038_v36 }
 0x104   :  { %901 = vmatpush.msra.mxu1 %v1043_v49  ;;  %882 = vmatpush.msra.mxu0 %v2009_v62 }
 0x105   :  { %924 = vmatpush.msra.mxu2 %v1045_v51  ;;  %947 = vmatpush.msra.mxu3 %v1039_v39  ;;  %v364_v27 = vpop.f32.mrf.mxu1 }
 0x106   :  { %902 = vmatpush.msra.mxu1 %v1044_v50  ;;  %883 = vmatpush.msra.mxu0 %v2028_v9  ;;  %v226_v23 = vpop.f32.mrf.mxu0 }
 0x107   :  { %925 = vmatpush.msra.mxu2 %v1047_v53  ;;  %948 = vmatpush.msra.mxu3 %v1040_v44  ;;  %v324_v29 = vpop.f32.mrf.mxu3  ;;  %v227_v41 = vadd.f32 %v226_v23, %v206_v24 }
 0x108   :  { %903 = vmatpush.msra.mxu1 %v1046_v52  ;;  %884 = vmatpush.msra.mxu0 %v1048_v54  ;;  %v304_v25 = vpop.f32.mrf.mxu2 }
 0x109   :  { %926 = vmatpush.msra.mxu2 %v1050_v57  ;;  %949 = vmatpush.msra.mxu3 %v1041_v47  ;;  %v325_v39 = vadd.f32 %v324_v29, %v304_v25  ;;  %v247_v45 = vadd.f32 %v246_v21, %v227_v41 }
 0x10a   :  { %904 = vmatpush.msra.mxu1 %v1049_v56  ;;  %885 = vmatpush.msra.mxu0 %v1051_v61 }
 0x10b   :  { %927 = vmatpush.msra.mxu2 %v1053_v32  ;;  %950 = vmatpush.msra.mxu3 %v1042_v48  ;;  %v150_v48 = vadd.f32 %v149_v17, %v130_v40  ;;  %v267_v51 = vadd.f32 %v266_v22, %v247_v45 }
 0x10c   :  { %905 = vmatpush.msra.mxu1 %v1052_v42  ;;  %886 = vmatpush.msra.mxu0 %v1054_v59 }
 0x10d   :  { %928 = vmatpush.msra.mxu2 %v1056_v63  ;;  %1003 = vmatmul.msk.f32.vlgmr.msra.gmra.mxu3 %vm85_vm1, %v869_v60  ;;  %v402_v31 = vpop.f32.mrf.mxu1  ;;  %v170_v57 = vadd.f32 %v169_v20, %v150_v48 }
 0x10e   :  { %906 = vmatpush.msra.mxu1 %v1055_v55  ;;  %887 = vmatpush.msra.mxu0 %v1057_v5  ;;  %v344_v28 = vpop.f32.mrf.mxu0 }
 0x10f   :  { %929 = vmatpush.msra.mxu2 %v1059_v3  ;;  %1005 = vset.pattern.permute.xlu0 %v1067_v4  ;;  %v442_v30 = vpop.f32.mrf.mxu3  ;;  %v345_v49 = vadd.f32 %v344_v28, %v325_v39  ;;  %v269_v59 = vmax.f32 %v170_v57, %v267_v51 }
 0x110   :  { %907 = vmatpush.msra.mxu1 %v1058_v0  ;;  %888 = vmatpush.msra.mxu0 %v1060_v6  ;;  %v422_v26 = vpop.f32.mrf.mxu2 }
 0x111   :  { %930 = vmatpush.msra.mxu2 %v1062_v8  ;;  %959 = vperm.xlu0 %1005, %v956_v2   ;;  %v423_v44 = vadd.f32 %v422_v26, %v402_v31  ;;  %v365_v61 = vadd.f32 %v364_v27, %v345_v49 }
 0x112   :  { %908 = vmatpush.msra.mxu1 %v1061_v7  ;;  %931 = vmatmul.f32.vlgmr.msra.gmra.mxu2 %v868_v1 }
 0x113   :  { %889 = vmatpush.msra.mxu0 %v1063_v10  ;;  %v443_v52 = vadd.f32 %v442_v30, %v423_v44  ;;  %v367_v2 = vmax.f32 %v269_v59, %v365_v61 }
 0x114   :  { %909 = vmatpush.msra.mxu1 %v1064_v12 }
 0x115   :  { %890 = vmatpush.msra.mxu0 %v1065_v14 }
 0x116   :  { %910 = vmatpush.msra.mxu1 %v1066_v15  ;;  %891 = vmatmul.f32.vlgmr.msra.gmra.mxu0 %v866_v11  ;;  %v462_v33 = vpop.f32.mrf.mxu0 }
 0x117   :  { %911 = vmatmul.f32.vlgmr.msra.gmra.mxu1 %v867_v13  ;;  %v463_v55 = vadd.f32 %v462_v33, %v443_v52 }
 0x119   :  { %v465_v4 = vmax.f32 %v367_v2, %v463_v55 }
 0x11e   :  { %v520_v35 = vpop.f32.mrf.mxu1  ;;  %v540_v62 = vpop.f32.mrf.mxu2 }
 0x11f   :  { %v500_v34 = vpop.f32.mrf.mxu0 }
 0x120   :  { %v521_v50 = vadd.f32 %v520_v35, %v500_v34 }
 0x121   :  { %v560_v43 = vpop.f32.mrf.mxu3 }
 0x122   :  { %v541_v42 = vadd.f32 %v540_v62, %v521_v50 }
 0x124   :  { %v561_v3 = vadd.f32 %v560_v43, %v541_v42 }
 0x126   :  { %v563_v8 = vmax.f32 %v465_v4, %v561_v3 }
 0x13a   :  { %v598_v58 = vpop.f32.mrf.mxu3 }
 0x13b   :  { %v618_v18 = vpop.f32.mrf.mxu0 }
 0x13c   :  { %v619_v53 = vadd.f32 %v618_v18, %v598_v58 }
 0x13e   :  { %v638_v9 = vpop.f32.mrf.mxu1 }
 0x13f   :  { %v658_v38 = vpop.f32.mrf.mxu2  ;;  %v639_v63 = vadd.f32 %v638_v9, %v619_v53 }
 0x141   :  { %v659_v6 = vadd.f32 %v658_v38, %v639_v63 }
 0x143   :  { %v661_v13 = vmax.f32 %v563_v8, %v659_v6 }
 0x15a   :  { %v696_v37 = vpop.f32.mrf.mxu2  ;;  %v716_v47 = vpop.f32.mrf.mxu3 }
 0x15b   :  { %v717_v60 = vadd.f32 %v716_v47, %v696_v37 }
 0x15d   :  { %v736_v46 = vpop.f32.mrf.mxu0 }
 0x15e   :  { %v737_v1 = vadd.f32 %v736_v46, %v717_v60 }
 0x15f   :  { %v756_v36 = vpop.f32.mrf.mxu1 }
 0x160   :  { %v757_v10 = vadd.f32 %v756_v36, %v737_v1 }
 0x162   :  { %v759_v19 = vmax.f32 %v661_v13, %v757_v10 }
 0x174   :  { %v794_v54 = vpop.f32.mrf.mxu1 }
 0x175   :  { %v814_v56 = vpop.f32.mrf.mxu2 }
 0x176   :  { %v854_v32 = vpop.f32.mrf.mxu0  ;;  %v815_v5 = vadd.f32 %v814_v56, %v794_v54 }
 0x178   :  { %v834_v0 = vpop.f32.mrf.mxu3 }
 0x179   :  { %v835_v7 = vadd.f32 %v834_v0, %v815_v5 }
 0x17b   :  { %v855_v14 = vadd.f32 %v854_v32, %v835_v7 }
 0x17d   :  { %v857_v21 = vmax.f32 %v759_v19, %v855_v14 }
 0x183   :  { %v960_v23 = vpop.permute.xlu0 %959 }
 0x190   :  { %v952_v17 = vpop.f32.mrf.mxu3 }
 0x193   :  { %v892_v11 = vpop.f32.mrf.mxu0 }
 0x194   :  { %v912_v12 = vpop.f32.mrf.mxu1 }
 0x195   :  { %v913_v15 = vadd.f32 %v912_v12, %v892_v11  ;;  %v932_v16 = vpop.f32.mrf.mxu2 }
 0x197   :  { %v933_v20 = vadd.f32 %v932_v16, %v913_v15 }
 0x199   :  { %v953_v22 = vadd.f32 %v952_v17, %v933_v20 }
 0x19b   :  { %v955_v24 = vmax.f32 %v857_v21, %v953_v22 }
 0x19d   :  { %v962_v25 = vadd.f32 %v960_v23, %v955_v24 }
 0x19f   :  { %1006 = vtanh.f32 %v962_v25 }
 0x1a5   :  { %v1007_v27 = vpop.eup %1006 }
 0x1a6   :  { %1008 = vtanh.f32 %v1007_v27 }
 0x1ac   :  { %v1009_v28 = vpop.eup %1008 }
 0x1ad   :  { %965 = vst [vmem:[%s2188_s3] sm:$0xf] %v1009_v28 }

</bundles_post_ra>
